<compile_context>
chip_gen: v5e
topology: v5e:2x2
jax: 0.10.0
libtpu: 0.0.40
codegen_flags: <defaults>
</compile_context>

<pallas_src>
import functools

import jax
import jax.numpy as jnp
from jax.experimental import pallas as pl
from jax.experimental.pallas import tpu as pltpu

EPS = 1e-4

# ----------------------------- model config ---------------------------------
NCLASS = 4
INPUT_SIZE = 8
HIDDEN_SIZE = 32          # hidden_sizes = [32]
PATH_SIZE = 3             # path_sizes  = [3]
SIGMA = 0.5               # kernel_args -> alpha = 1 / sigma**2
ALPHA = 1.0 / (SIGMA ** 2)

N_GRAPHS = 2
NODES_PER_GRAPH = 8
N_NODES = N_GRAPHS * NODES_PER_GRAPH

D = PATH_SIZE * INPUT_SIZE


# ------------------------------ Pallas kernel --------------------------------
def gckn_kernel(pf_ref, wa_ref, gp_ref, m_ref, bias_ref, out_ref, *, alpha):
    """Single-step kernel: everything fits in one VMEM tile.

    pf_ref   : (D, P)        path embeddings, path axis lane-major
    wa_ref   : (H, D)        alpha * anchors (alpha folded into the weights)
    gp_ref   : (P, G)        fused pooling matrix = graph-sum o norms o path-mean
    m_ref    : (C, H)        fused (lintrans @ Wc^T)^T
    bias_ref : (C, 1)        classifier bias (broadcast over graphs)
    out_ref  : (C, G)        transposed logits (wrapper transposes back)
    """
    # (H, D) @ (D, P) -> (H, P): lane-dense intermediate (path axis on lanes).
    s = jnp.dot(wa_ref[...], pf_ref[...], preferred_element_type=jnp.float32)
    # exp kernel.  NOTE: zero-padded path columns give b = exp(-alpha) != 0 here;
    # they are masked because gp has all-zero columns for padded paths
    # (owner == -1).  Keep that invariant if gp construction is ever changed.
    b = jnp.exp(s - alpha)
    # fused pooling: per-node mean, norm rescale and graph sum in one matmul.
    pooled = jnp.dot(b, gp_ref[...], preferred_element_type=jnp.float32)   # (H, G)
    # fused lintrans + classifier.
    out_ref[...] = (jnp.dot(m_ref[...], pooled,
                            preferred_element_type=jnp.float32)
                    + bias_ref[...])                                        # (C, G)


def gcknet_forward(features, paths_indices, path_owner, n_paths_per_node,
                   graph_ids, n_graphs, params):
    """features: (n_nodes, input_size) f32; paths_indices: (n_paths, path_size) i32."""
    n_nodes = features.shape[0]
    n_real = paths_indices.shape[0]
    n_paths_pad = ((n_real + 127) // 128) * 128      # lane-align the path axis

    # ---- glue: normalization + path gather ----
    norms = jnp.sqrt(jnp.sum(features * features, axis=-1, keepdims=True))
    norms = jnp.maximum(norms, EPS)
    x_norm = features / norms

    # TODO(synk): move this gather in-kernel (scalar-prefetched indices +
    # pl.Element row gather) if the path count ever becomes HBM-bandwidth
    # relevant; at this size it is pure wrapper glue.
    pf = x_norm[paths_indices].reshape(n_real, -1) / jnp.sqrt(float(PATH_SIZE))
    pf_t = jnp.pad(pf, ((0, n_paths_pad - n_real), (0, 0))).T      # (D, P)

    # ---- fused pooling matrix: graph-sum o diag(norms) o per-node path mean ----
    owner_pad = jnp.pad(path_owner, (0, n_paths_pad - n_real), constant_values=-1)
    onehot = (owner_pad[None, :] ==
              jnp.arange(n_nodes)[:, None]).astype(jnp.float32)      # (n_nodes, P)
    scale = norms[:, 0] / jnp.maximum(n_paths_per_node, 1).astype(jnp.float32)
    g_mat = (graph_ids[None, :] ==
             jnp.arange(n_graphs)[:, None]).astype(jnp.float32)      # (G, n_nodes)
    gp_t = ((g_mat * scale[None, :]) @ onehot).T                     # (P, G)

    # ---- fused parameters ----
    wa = ALPHA * params["W"]                                         # (H, D)
    m_t = params["Wc"] @ params["lintrans"].T                        # (C, H) = (lintrans @ Wc^T)^T
    bias_t = params["bias"][:, None]                                 # (C, 1)

    kernel = functools.partial(gckn_kernel, alpha=ALPHA)
    logits_t = pl.pallas_call(
        kernel,
        out_shape=jax.ShapeDtypeStruct((NCLASS, n_graphs), jnp.float32),
        grid=(1,),
        in_specs=[
            pl.BlockSpec((D, n_paths_pad), lambda i: (0, 0)),          # path feats^T
            pl.BlockSpec((HIDDEN_SIZE, D), lambda i: (0, 0)),          # alpha*anchors
            pl.BlockSpec((n_paths_pad, n_graphs), lambda i: (0, 0)),   # fused pooling
            pl.BlockSpec((NCLASS, HIDDEN_SIZE), lambda i: (0, 0)),     # lintrans@Wc^T (T)
            pl.BlockSpec((NCLASS, 1), lambda i: (0, 0)),               # bias
        ],
        out_specs=pl.BlockSpec((NCLASS, n_graphs), lambda i: (0, 0)),
        compiler_params=pltpu.CompilerParams(
            dimension_semantics=("arbitrary",)),
    )(pf_t, wa, gp_t, m_t, bias_t)
    return logits_t.T                                                # (G, C)


# ------------------------- pure-JAX reference --------------------------------
def gcknet_reference(features, paths_indices, path_owner, n_paths_per_node,
                     graph_ids, n_graphs, params):
    norms = jnp.maximum(
        jnp.sqrt(jnp.sum(features * features, axis=-1, keepdims=True)), EPS)
    x_norm = features / norms
    pf = x_norm[paths_indices].reshape(paths_indices.shape[0], -1)
    pf = pf / jnp.sqrt(float(PATH_SIZE))
    s = pf @ params["W"].T
    b = jnp.exp(ALPHA * (s - 1.0))
    onehot = (path_owner[None, :] ==
              jnp.arange(features.shape[0])[:, None]).astype(jnp.float32)
    p_mat = onehot / jnp.maximum(n_paths_per_node, 1).astype(jnp.float32)[:, None]
    pooled = p_mat @ b
    node = (pooled @ params["lintrans"]) * norms
    g_mat = (graph_ids[None, :] ==
             jnp.arange(n_graphs)[:, None]).astype(jnp.float32)
    graph = g_mat @ node
    return graph @ params["Wc"].T + params["bias"][None, :]


# ------------------------------ main ------------------------------------------
if __name__ == "__main__":
    key = jax.random.PRNGKey(0)
    k_w, k_c, k_f, k_p = jax.random.split(key, 4)

    # --- deterministic parameters ---
    W = jax.random.normal(k_w, (HIDDEN_SIZE, D), dtype=jnp.float32)
    W = W / jnp.linalg.norm(W, axis=-1, keepdims=True)            # unit-norm anchors
    kzz = jnp.exp(ALPHA * (W @ W.T - 1.0)) + 1e-3 * jnp.eye(HIDDEN_SIZE)
    evals, evecs = jnp.linalg.eigh(kzz)
    lintrans = (evecs * (1.0 / jnp.sqrt(jnp.maximum(evals, 1e-12)))) @ evecs.T
    Wc = jax.random.normal(k_c, (NCLASS, HIDDEN_SIZE), dtype=jnp.float32)
    Wc = Wc / jnp.sqrt(float(HIDDEN_SIZE))
    bias = jnp.zeros((NCLASS,), dtype=jnp.float32)
    params = {"W": W, "lintrans": lintrans, "Wc": Wc, "bias": bias}

    # --- deterministic inputs ---
    features = jax.random.normal(k_f, (N_NODES, INPUT_SIZE), dtype=jnp.float32)
    graph_ids = (jnp.arange(N_NODES) // NODES_PER_GRAPH).astype(jnp.int32)

    # paths per node: deterministic pattern 2,3,4,2,3,4,... (total 47 paths)
    counts = (2 + (jnp.arange(N_NODES) % 3)).astype(jnp.int32)
    counts_host = jax.device_get(counts)

    path_rows, owners = [], []
    kk = k_p
    for u in range(N_NODES):
        g = u // NODES_PER_GRAPH
        lo, hi = g * NODES_PER_GRAPH, (g + 1) * NODES_PER_GRAPH
        for _ in range(int(counts_host[u])):
            kk, sub = jax.random.split(kk)
            rest = jax.random.randint(sub, (PATH_SIZE - 1,), lo, hi)
            path_rows.append(
                jnp.concatenate([jnp.array([u], dtype=jnp.int32),
                                 rest.astype(jnp.int32)]))
            owners.append(u)
    paths_indices = jnp.stack(path_rows).astype(jnp.int32)        # (47, 3)
    path_owner = jnp.array(owners, dtype=jnp.int32)               # (47,)

    logits = gcknet_forward(features, paths_indices, path_owner, counts,
                            graph_ids, N_GRAPHS, params)
    logits = jax.block_until_ready(logits)

    ref = gcknet_reference(features, paths_indices, path_owner, counts,
                           graph_ids, N_GRAPHS, params)
    assert logits.shape == (N_GRAPHS, NCLASS)
    # Tolerance accounts for f32 reassociation introduced by the algebraic
    # fusion (pooling / lintrans / classifier folded into precomputed matrices).
    assert jnp.allclose(logits, ref, rtol=1e-3, atol=1e-3), (logits, ref)
    print("KERNEL_OK")
</pallas_src>

<mosaic_0001>
module attributes {stable_mosaic.version = 11 : i64} {
  func.func @gckn_kernel(%arg0: i32, %arg1: memref<24x128xf32, #tpu.memory_space<vmem>>, %arg2: memref<32x24xf32, #tpu.memory_space<vmem>>, %arg3: memref<128x2xf32, #tpu.memory_space<vmem>>, %arg4: memref<4x32xf32, #tpu.memory_space<vmem>>, %arg5: memref<4x1xf32, #tpu.memory_space<vmem>>, %arg6: memref<4x2xf32, #tpu.memory_space<vmem>>) attributes {dimension_semantics = [#tpu.dimension_semantics<arbitrary>], iteration_bounds = array<i64: 1>, scalar_prefetch = 0 : i64, scratch_operands = 0 : i64, tpu.core_type = #tpu.core_type<tc>, window_params = [{pipeline_mode = #tpu.pipeline_mode<synchronous>, transform_indices = @transform_0, window_bounds = array<i64: 24, 128>}, {pipeline_mode = #tpu.pipeline_mode<synchronous>, transform_indices = @transform_1, window_bounds = array<i64: 32, 24>}, {pipeline_mode = #tpu.pipeline_mode<synchronous>, transform_indices = @transform_2, window_bounds = array<i64: 128, 2>}, {pipeline_mode = #tpu.pipeline_mode<synchronous>, transform_indices = @transform_3, window_bounds = array<i64: 4, 32>}, {pipeline_mode = #tpu.pipeline_mode<synchronous>, transform_indices = @transform_4, window_bounds = array<i64: 4, 1>}, {pipeline_mode = #tpu.pipeline_mode<synchronous>, transform_indices = @transform_5, window_bounds = array<i64: 4, 2>}]} {
    %c0 = arith.constant 0 : index
    %c0_0 = arith.constant 0 : index
    %0 = vector.load %arg2[%c0, %c0_0] : memref<32x24xf32, #tpu.memory_space<vmem>>, vector<32x24xf32>
    %c0_1 = arith.constant 0 : index
    %c0_2 = arith.constant 0 : index
    %1 = vector.load %arg1[%c0_1, %c0_2] : memref<24x128xf32, #tpu.memory_space<vmem>>, vector<24x128xf32>
    %cst = arith.constant dense<0.000000e+00> : vector<32x128xf32>
    %2 = tpu.matmul %0, %1, %cst {dimension_numbers = #tpu.dot_dimension_numbers<[1], [0], [0], [1], [0, 0, 1, 1], [], []>} : vector<32x24xf32>, vector<24x128xf32>, vector<32x128xf32> -> vector<32x128xf32>
    %cst_3 = arith.constant 4.000000e+00 : f32
    %3 = vector.broadcast %cst_3 : f32 to vector<32x128xf32>
    %4 = arith.subf %2, %3 : vector<32x128xf32>
    %5 = math.exp %4 : vector<32x128xf32>
    %c0_4 = arith.constant 0 : index
    %c0_5 = arith.constant 0 : index
    %6 = vector.load %arg3[%c0_4, %c0_5] : memref<128x2xf32, #tpu.memory_space<vmem>>, vector<128x2xf32>
    %cst_6 = arith.constant dense<0.000000e+00> : vector<32x2xf32>
    %7 = tpu.matmul %5, %6, %cst_6 {dimension_numbers = #tpu.dot_dimension_numbers<[1], [0], [0], [1], [0, 0, 1, 1], [], []>} : vector<32x128xf32>, vector<128x2xf32>, vector<32x2xf32> -> vector<32x2xf32>
    %c0_7 = arith.constant 0 : index
    %c0_8 = arith.constant 0 : index
    %8 = vector.load %arg4[%c0_7, %c0_8] : memref<4x32xf32, #tpu.memory_space<vmem>>, vector<4x32xf32>
    %cst_9 = arith.constant dense<0.000000e+00> : vector<4x2xf32>
    %9 = tpu.matmul %8, %7, %cst_9 {dimension_numbers = #tpu.dot_dimension_numbers<[1], [0], [0], [1], [0, 0, 1, 1], [], []>} : vector<4x32xf32>, vector<32x2xf32>, vector<4x2xf32> -> vector<4x2xf32>
    %c0_10 = arith.constant 0 : index
    %c0_11 = arith.constant 0 : index
    %10 = vector.load %arg5[%c0_10, %c0_11] : memref<4x1xf32, #tpu.memory_space<vmem>>, vector<4x1xf32>
    %11 = vector.broadcast %10 : vector<4x1xf32> to vector<4x2xf32>
    %12 = arith.addf %9, %11 : vector<4x2xf32>
    %c0_12 = arith.constant 0 : index
    %c0_13 = arith.constant 0 : index
    %13 = vector.load %arg6[%c0_12, %c0_13] : memref<4x2xf32, #tpu.memory_space<vmem>>, vector<4x2xf32>
    tpu.vector_store %arg6[%c0_12, %c0_13], %12 {strides = array<i32>} : memref<4x2xf32, #tpu.memory_space<vmem>>, vector<4x2xf32>,
    return
  }
  func.func @transform_0(%arg0: i32) -> (i32, i32) {
    %c0_i32 = arith.constant 0 : i32
    %c0_i32_0 = arith.constant 0 : i32
    %c0_i32_1 = arith.constant 0 : i32
    return %c0_i32, %c0_i32_0 : i32, i32
  }
  func.func @transform_1(%arg0: i32) -> (i32, i32) {
    %c0_i32 = arith.constant 0 : i32
    %c0_i32_0 = arith.constant 0 : i32
    %c0_i32_1 = arith.constant 0 : i32
    return %c0_i32, %c0_i32_0 : i32, i32
  }
  func.func @transform_2(%arg0: i32) -> (i32, i32) {
    %c0_i32 = arith.constant 0 : i32
    %c0_i32_0 = arith.constant 0 : i32
    %c0_i32_1 = arith.constant 0 : i32
    return %c0_i32, %c0_i32_0 : i32, i32
  }
  func.func @transform_3(%arg0: i32) -> (i32, i32) {
    %c0_i32 = arith.constant 0 : i32
    %c0_i32_0 = arith.constant 0 : i32
    %c0_i32_1 = arith.constant 0 : i32
    return %c0_i32, %c0_i32_0 : i32, i32
  }
  func.func @transform_4(%arg0: i32) -> (i32, i32) {
    %c0_i32 = arith.constant 0 : i32
    %c0_i32_0 = arith.constant 0 : i32
    %c0_i32_1 = arith.constant 0 : i32
    return %c0_i32, %c0_i32_0 : i32, i32
  }
  func.func @transform_5(%arg0: i32) -> (i32, i32) {
    %c0_i32 = arith.constant 0 : i32
    %c0_i32_0 = arith.constant 0 : i32
    %c0_i32_1 = arith.constant 0 : i32
    return %c0_i32, %c0_i32_0 : i32, i32
  }
}

</mosaic_0001>

<bundles_post_ra>
// kernel: tpu_custom_call.1
= control target key start
LH: loop header
LB: loop body
LE: loop exit
PB: predicated region body
PF: predicated region fallthrough
CT: control target
= control target key end

     0   :  { %vm27_vm0 = vcmask 195584   ;;  %v214_v40 = vmov 0   ;;  %vm133_vm1 = vcmask 261120   ;;  %vm157_vm2 = vcmask 11264   ;;  %s327_s0 = inlined_call_operand.vmem [shape: f32[24,128], index: 0, kind: input, shape index: {}]   ;;  %s328_s2 = inlined_call_operand.vmem [shape: f32[128,2], index: 2, kind: input, shape index: {}]   ;;  %s329_s1 = inlined_call_operand.vmem [shape: f32[32,24], index: 1, kind: input, shape index: {}]   ;;  %s330_s4 = inlined_call_operand.vmem [shape: f32[4,1], index: 4, kind: input, shape index: {}]   ;;  %s331_s3 = inlined_call_operand.vmem [shape: f32[4,32], index: 3, kind: input, shape index: {}]   ;;  %s332_s5 = inlined_call_operand.vmem [shape: f32[4,2], index: 5, kind: output, shape index: {}]  }
   0x1   :  { %v26_v0 = vld [vmem:[%s327_s0 + $0x10] sm:$0xff]  ;;  %v25_v1 = vld [vmem:[%s327_s0 + $0x8] sm:$0xff]  ;;  %v24_v2 = vld [vmem:[%s327_s0] sm:$0xff]  ;;  %205 = vset.pattern.permute.xlu0 %v214_v40 }
   0x2   :  { %53 = vmatpush.msra.mxu0 %v26_v0  ;;  %v96_v3 = vld [vmem:[%s328_s2 + $0x78] sm:$0xff]  ;;  %v20_v4 = vld [vmem:[%s329_s1] sm:$0xff]  ;;  %v95_v5 = vld [vmem:[%s328_s2 + $0x70] sm:$0xff] }
   0x3   :  { %172 = vmatpush.msra.mxu1 %v96_v3  ;;  %173 = vmatpush.msra.mxu3 %v96_v3  ;;  %v94_v6 = vld [vmem:[%s328_s2 + $0x68] sm:$0xff]  ;;  %v93_v7 = vld [vmem:[%s328_s2 + $0x60] sm:$0xff]  ;;  %v92_v8 = vld [vmem:[%s328_s2 + $0x58] sm:$0xff] }
   0x4   :  { %54 = vmatpush.msra.mxu0 %v25_v1  ;;  %v21_v9 = vld [vmem:[%s329_s1 + $0x8] sm:$0xff]  ;;  %v91_v10 = vld [vmem:[%s328_s2 + $0x50] sm:$0xff]  ;;  %v89_v12 = vld [vmem:[%s328_s2 + $0x40] sm:$0xff] }
   0x5   :  { %174 = vmatpush.msra.mxu1 %v95_v5  ;;  %175 = vmatpush.msra.mxu3 %v95_v5  ;;  %v90_v11 = vld [vmem:[%s328_s2 + $0x48] sm:$0xff]  ;;  %v88_v13 = vld [vmem:[%s328_s2 + $0x38] sm:$0xff]  ;;  %v22_v14 = vld [vmem:[%s329_s1 + $0x10] sm:$0xff] }
   0x6   :  { %55 = vmatpush.msra.mxu0 %v24_v2  ;;  %v87_v15 = vld [vmem:[%s328_s2 + $0x30] sm:$0xff]  ;;  %v23_v16 = vld [vmem:[%s329_s1 + $0x18] sm:$0xff]  ;;  %v86_v17 = vld [vmem:[%s328_s2 + $0x28] sm:$0xff] }
   0x7   :  { %163 = vmatmul.msk.f32.vlgmr.msra.gmra.mxu0 %vm27_vm0, %v20_v4  ;;  %176 = vmatpush.msra.mxu1 %v94_v6  ;;  %v85_v18 = vld [vmem:[%s328_s2 + $0x20] sm:$0xff]  ;;  %v84_v19 = vld [vmem:[%s328_s2 + $0x18] sm:$0xff]  ;;  %v83_v20 = vld [vmem:[%s328_s2 + $0x10] sm:$0xff] }
   0x8   :  { %97 = vmatpush.msrb.mxu0 %v96_v3  ;;  %177 = vmatpush.msra.mxu3 %v94_v6  ;;  %v82_v21 = vld [vmem:[%s328_s2 + $0x8] sm:$0xff]  ;;  %v81_v22 = vld [vmem:[%s328_s2] sm:$0xff] }
   0x9   :  { %178 = vmatpush.msra.mxu1 %v93_v7  ;;  %v127_v39 = vld [vmem:[%s330_s4] sm:$0xf] }
   0xa   :  { %98 = vmatpush.msrb.mxu0 %v95_v5  ;;  %179 = vmatpush.msra.mxu3 %v93_v7  ;;  %v126_v44 = vld [vmem:[%s331_s3] sm:$0xf] }
   0xb   :  { %180 = vmatpush.msra.mxu1 %v92_v8  ;;  %130 = vperm.xlu0 %205, %v127_v39  }
   0xc   :  { %99 = vmatpush.msrb.mxu0 %v94_v6  ;;  %181 = vmatpush.msra.mxu3 %v92_v8 }
   0xd   :  { %182 = vmatpush.msra.mxu1 %v91_v10 }
   0xe   :  { %100 = vmatpush.msrb.mxu0 %v93_v7  ;;  %183 = vmatpush.msra.mxu3 %v91_v10 }
   0xf   :  { %164 = vmatmul.msk.f32.gmra.mxu0 %vm27_vm0, %v21_v9  ;;  %184 = vmatpush.msra.mxu1 %v90_v11 }
  0x10   :  { %101 = vmatpush.msrb.mxu0 %v92_v8  ;;  %185 = vmatpush.msra.mxu3 %v90_v11 }
  0x11   :  { %186 = vmatpush.msra.mxu1 %v89_v12 }
  0x12   :  { %102 = vmatpush.msrb.mxu0 %v91_v10  ;;  %187 = vmatpush.msra.mxu3 %v89_v12 }
  0x13   :  { %188 = vmatpush.msra.mxu1 %v88_v13 }
  0x14   :  { %103 = vmatpush.msrb.mxu0 %v90_v11  ;;  %189 = vmatpush.msra.mxu3 %v88_v13 }
  0x15   :  { %190 = vmatpush.msra.mxu1 %v87_v15 }
  0x16   :  { %104 = vmatpush.msrb.mxu0 %v89_v12  ;;  %191 = vmatpush.msra.mxu3 %v87_v15 }
  0x17   :  { %165 = vmatmul.msk.f32.gmra.mxu0 %vm27_vm0, %v22_v14  ;;  %192 = vmatpush.msra.mxu1 %v86_v17 }
  0x18   :  { %105 = vmatpush.msrb.mxu0 %v88_v13  ;;  %193 = vmatpush.msra.mxu3 %v86_v17 }
  0x19   :  { %194 = vmatpush.msra.mxu1 %v85_v18 }
  0x1a   :  { %106 = vmatpush.msrb.mxu0 %v87_v15  ;;  %195 = vmatpush.msra.mxu3 %v85_v18 }
  0x1b   :  { %196 = vmatpush.msra.mxu1 %v84_v19 }
  0x1c   :  { %107 = vmatpush.msrb.mxu0 %v86_v17  ;;  %197 = vmatpush.msra.mxu3 %v84_v19 }
  0x1d   :  { %198 = vmatpush.msra.mxu1 %v83_v20 }
  0x1e   :  { %108 = vmatpush.msrb.mxu0 %v85_v18  ;;  %199 = vmatpush.msra.mxu3 %v83_v20 }
  0x1f   :  { %166 = vmatmul.msk.f32.gmra.mxu0 %vm27_vm0, %v23_v16  ;;  %200 = vmatpush.msra.mxu1 %v82_v21 }
  0x20   :  { %109 = vmatpush.msrb.mxu0 %v84_v19  ;;  %201 = vmatpush.msra.mxu3 %v82_v21 }
  0x21   :  { %202 = vmatpush.msra.mxu1 %v81_v22 }
  0x22   :  { %110 = vmatpush.msrb.mxu0 %v83_v20  ;;  %203 = vmatpush.msra.mxu3 %v81_v22 }
  0x24   :  { %111 = vmatpush.msrb.mxu0 %v82_v21 }
  0x26   :  { %112 = vmatpush.msrb.mxu0 %v81_v22 }
  0x7d   :  { %v131_v46 = vpop.permute.xlu0 %130 }
  0x84   :  { %v57_v23 = vpop.f32.mrf.mxu0 }
  0x85   :  { %v167_v24 = vadd.f32 -4.0, %v57_v23 }
  0x87   :  { %v73_v25 = vmul.f32 1.442695, %v167_v24 }
  0x89   :  { %206 = vpow2.f32 %v73_v25 }
  0x8c   :  { %v60_v26 = vpop.f32.mrf.mxu0 }
  0x8d   :  { %v168_v27 = vadd.f32 -4.0, %v60_v26 }
  0x8f   :  { %v207_v28 = vpop.eup %206  ;;  %v75_v29 = vmul.f32 1.442695, %v168_v27 }
  0x90   :  { %113 = vmatmul.f32.vlgmr.msrb.gmra.mxu0 %v207_v28 }
  0x91   :  { %208 = vpow2.f32 %v75_v29 }
  0x94   :  { %v63_v30 = vpop.f32.mrf.mxu0 }
  0x95   :  { %v169_v31 = vadd.f32 -4.0, %v63_v30 }
  0x97   :  { %v209_v32 = vpop.eup %208  ;;  %v77_v33 = vmul.f32 1.442695, %v169_v31 }
  0x98   :  { %116 = vmatmul.f32.vlgmr.msra.gmra.mxu1 %v209_v32 }
  0x99   :  { %210 = vpow2.f32 %v77_v33 }
  0x9c   :  { %v66_v34 = vpop.f32.mrf.mxu0 }
  0x9d   :  { %v170_v35 = vadd.f32 -4.0, %v66_v34 }
  0x9f   :  { %v211_v36 = vpop.eup %210  ;;  %v79_v37 = vmul.f32 1.442695, %v170_v35 }
  0xa0   :  { %119 = vmatmul.f32.vlgmr.msra.gmra.mxu3 %v211_v36 }
  0xa1   :  { %212 = vpow2.f32 %v79_v37 }
  0xa7   :  { %v213_v38 = vpop.eup %212 }
  0xa8   :  { %122 = vmatmul.f32.gmra.mxu3 %v213_v38 }
 0x10d   :  { %v114_v45 = vpop.f32.mrf.mxu0 }
 0x115   :  { %v117_v43 = vpop.f32.mrf.mxu1 }
 0x123   :  { %v120_v41 = vpop.f32.mrf.mxu3 }
 0x12b   :  { %v123_v42 = vpop.f32.mrf.mxu3 }
 0x12c   :  { %149 = vmatpush.msra.mxu2 %v123_v42 }
 0x12e   :  { %150 = vmatpush.msra.mxu2 %v120_v41 }
 0x130   :  { %151 = vmatpush.msra.mxu2 %v117_v43 }
 0x132   :  { %152 = vmatpush.msra.mxu2 %v114_v45 }
 0x133   :  { %171 = vmatmul.msk.f32.vlgmr.msra.gmra.mxu2 %vm133_vm1, %v126_v44 }
 0x1b6   :  { %v154_v47 = vpop.f32.mrf.mxu2 }
 0x1b7   :  { %v155_v48 = vadd.f32 %v154_v47, %v131_v46 }
 0x1b9   :  { %158 = vst.msk [vmem:[%s332_s5] sm:$0xf] %vm157_vm2, %v155_v48 }

</bundles_post_ra>
